<compile_context>
chip_gen: v7x
topology: tpu7x:2x2x1
jax: 0.10.0
libtpu: 0.0.40
codegen_flags: <defaults>
</compile_context>

<pallas_src>
import jax
import jax.numpy as jnp
import numpy as np
from jax.experimental import pallas as pl
from jax.experimental.pallas import tpu as pltpu

N = 8                      # nodes per graph in the demo
F_HALF = 16                # half feature dim (x = [x1 | x2], each 16 wide)
F_FULL = 2 * F_HALF        # 32
NEG_SLOPE = 0.2            # GATConv LeakyReLU slope
MASK_OFF = -1e9            # additive mask for non-edges

# packed-parameter buffer layout (rows x 128 lanes, f32)
ROW_P = 0                  # rows [0, 32):  fused projection + e_dst matrix [32, 64+4N]
ROW_C = F_FULL             # rows [32, 36): e_src row-projection C          [4, 32]
ROW_BIAS = ROW_C + 4       # rows [36, 40): per-GAT output biases           [4, 16]
PARAM_ROWS = 40
PARAM_LANES = 128


# ----------------------------------------------------------------------------
# Pallas kernel: full GNF.forward for one graph (one grid step)
# ----------------------------------------------------------------------------
def gnf_kernel(data_ref, params_ref, out_ref):
    # data_ref:   [1, N+32, 32+N]   rows 0:N   = [x | adj_bias]
    #                               rows N:N+32 = x^T (lanes 0:N)
    # params_ref: [40, 128]         packed parameters (see layout above)
    # out_ref:    [1, N, 48]        x1_new | x2_new | logdet (bcast over 16 lanes)
    n = data_ref.shape[1] - F_FULL

    blk = data_ref[0]                                   # [N+32, 32+N]
    x = blk[0:n, 0:F_FULL]                              # [N, 32] = [x1 | x2]
    adj_bias = blk[0:n, F_FULL:F_FULL + n]              # [N, N]  0 / -1e9
    x_t = blk[n:n + F_FULL, 0:n]                        # [32, N]

    proj_w = params_ref[ROW_P:ROW_P + F_FULL, 0:4 * F_HALF + 4 * n]   # [32, 64+4N]
    c_rows = params_ref[ROW_C:ROW_C + 4, 0:F_FULL]                    # [4, 32]

    # ONE matmul: all four GAT projections h_F1|h_F2|h_G1|h_G2 (lanes 0:64)
    # plus all four lane-broadcast e_dst slabs (lanes 64:64+4N).
    proj = jnp.dot(x, proj_w, preferred_element_type=jnp.float32)     # [N, 64+4N]
    # ONE matmul: e_src rows for all four GATs (row k = e_src of GAT k).
    e_src_rows = jnp.dot(c_rows, x_t, preferred_element_type=jnp.float32)  # [4, N]

    def gat(k):
        # PyG GATConv (heads=1): logits[i, j] = a_dst.h_i + a_src.h_j for edge
        # j -> i, LeakyReLU, softmax over incoming j, out_i = sum_j a_ij h_j + b.
        h_k = proj[:, k * F_HALF:(k + 1) * F_HALF]                     # [N, 16]
        e_dst = proj[:, 4 * F_HALF + k * n: 4 * F_HALF + (k + 1) * n]  # [N, N]
        logits = e_dst + e_src_rows[k:k + 1, :]                        # [N, N]
        logits = jnp.where(logits > 0, logits, NEG_SLOPE * logits)     # LeakyReLU
        masked = logits + adj_bias          # non-edges ~ -1e9 -> exp underflows to 0
        m = jnp.max(masked, axis=1, keepdims=True)
        p = jnp.exp(masked - m)
        alpha = p / jnp.sum(p, axis=1, keepdims=True)                  # exact softmax
        b_k = params_ref[ROW_BIAS + k:ROW_BIAS + k + 1, 0:F_HALF]      # [1, 16]
        return jnp.dot(alpha, h_k, preferred_element_type=jnp.float32) + b_k

    s1, t1, s2, t2 = gat(0), gat(1), gat(2), gat(3)

    x1 = x[:, :F_HALF]
    x2 = x[:, F_HALF:]
    x1_new = x2 * jnp.exp(s1) + t1                      # f_a
    x2_new = x1_new * jnp.exp(s2) + t2                  # f_b
    logdet = (jnp.sum(s1, axis=1, keepdims=True)
              + jnp.sum(s2, axis=1, keepdims=True))                    # [N, 1]

    out_ref[0] = jnp.concatenate(
        [x1_new, x2_new, jnp.broadcast_to(logdet, (n, F_HALF))], axis=1)


# ----------------------------------------------------------------------------
# Wrapper: host-side packing + pallas_call
# ----------------------------------------------------------------------------
def pack_params(params, n):
    """Pack all GAT parameters into one lane-dense [40, 128] f32 buffer."""
    assert 4 * F_HALF + 4 * n <= PARAM_LANES
    buf = np.zeros((PARAM_ROWS, PARAM_LANES), np.float32)
    for k, name in enumerate(("F1", "F2", "G1", "G2")):
        p = params[name]
        w = np.asarray(p["W"], np.float32)                       # [out=16, in=16]
        a_src = np.asarray(p["att_src"], np.float32).reshape(-1)  # [16]
        a_dst = np.asarray(p["att_dst"], np.float32).reshape(-1)  # [16]
        bias = np.asarray(p["bias"], np.float32).reshape(-1)      # [16]
        ih = 0 if k < 2 else 1        # F1/F2 read x1 (rows 0:16), G1/G2 read x2
        r0, r1 = ih * F_HALF, (ih + 1) * F_HALF
        # fused projection block: proj[:, 16k:16(k+1)] = x_half @ W^T
        buf[ROW_P + r0:ROW_P + r1, k * F_HALF:(k + 1) * F_HALF] = w.T
        # e_dst lane-broadcast slab: every column of block k equals W^T a_dst
        buf[ROW_P + r0:ROW_P + r1,
            4 * F_HALF + k * n:4 * F_HALF + (k + 1) * n] = (w.T @ a_dst)[:, None]
        # e_src row projection: row k of C = W^T a_src (placed in the right half)
        buf[ROW_C + k, r0:r1] = w.T @ a_src
        # output bias
        buf[ROW_BIAS + k, :F_HALF] = bias
    return jnp.asarray(buf)


def make_adj_bias(edge_index, n):
    """Additive mask: 0 where edge (src j -> dst i) or self-loop, else -1e9."""
    adj = jnp.zeros((n, n), jnp.float32)
    adj = adj.at[edge_index[1], edge_index[0]].set(1.0)
    adj = adj.at[jnp.arange(n), jnp.arange(n)].set(1.0)       # self-loops (required)
    return jnp.where(adj > 0, 0.0, MASK_OFF).astype(jnp.float32)


def pack_data(xs, adj_biases):
    """Per-graph lane-dense data buffer: [B, N+32, 32+N] = [x|adj ; x^T]."""
    b, n, f = xs.shape
    data = jnp.zeros((b, n + F_FULL, F_FULL + n), jnp.float32)
    data = data.at[:, :n, :F_FULL].set(xs)
    data = data.at[:, :n, F_FULL:].set(adj_biases)
    data = data.at[:, n:, :n].set(jnp.swapaxes(xs, 1, 2))     # x^T (layout plumbing)
    return data


def gnf_forward_batched(xs, adj_biases, params):
    """xs: [B, N, 32] f32, adj_biases: [B, N, N] (0 / -1e9).  One pallas_call."""
    b, n, f = xs.shape
    assert f == F_FULL
    data = pack_data(xs, adj_biases)                          # [B, N+32, 32+N]
    packed_params = pack_params(params, n)                    # [40, 128]

    out = pl.pallas_call(
        gnf_kernel,
        grid=(b,),
        in_specs=[
            pl.BlockSpec((1, n + F_FULL, F_FULL + n), lambda i: (i, 0, 0)),
            pl.BlockSpec((PARAM_ROWS, PARAM_LANES), lambda i: (0, 0)),
        ],
        out_specs=pl.BlockSpec((1, n, 3 * F_HALF), lambda i: (i, 0, 0)),
        out_shape=jax.ShapeDtypeStruct((b, n, 3 * F_HALF), jnp.float32),
        compiler_params=pltpu.CompilerParams(
            dimension_semantics=("parallel",)),   # graphs split across TCs on v7x
    )(data, packed_params)

    return out[..., :F_HALF], out[..., F_HALF:F_FULL], out[..., F_FULL]


def gnf_forward(x, edge_index, params):
    """Single-graph GNF.forward (module interface): x [N,32], edge_index [2,E]."""
    adj_bias = make_adj_bias(edge_index, x.shape[0])
    x1, x2, ld = gnf_forward_batched(x[None], adj_bias[None], params)
    return x1[0], x2[0], ld[0]


# ----------------------------------------------------------------------------
# Pure-JAX reference (same math, no Pallas) for a correctness sanity check.
# ----------------------------------------------------------------------------
def _gat_ref(h_in, adj, p):
    h = h_in @ p["W"].T
    e_src = jnp.sum(h * p["att_src"], axis=1, keepdims=True)
    e_dst = jnp.sum(h * p["att_dst"], axis=1, keepdims=True)
    logits = e_dst + e_src.T
    logits = jnp.where(logits > 0, logits, NEG_SLOPE * logits)
    masked = jnp.where(adj > 0, logits, -1e9)
    m = jnp.max(masked, axis=1, keepdims=True)
    pexp = jnp.where(adj > 0, jnp.exp(masked - m), 0.0)
    alpha = pexp / jnp.sum(pexp, axis=1, keepdims=True)
    return alpha @ h + p["bias"]


def gnf_forward_ref(x, edge_index, params):
    n = x.shape[0]
    adj = jnp.zeros((n, n), jnp.float32)
    adj = adj.at[edge_index[1], edge_index[0]].set(1.0)
    adj = adj.at[jnp.arange(n), jnp.arange(n)].set(1.0)
    x1, x2 = x[:, :F_HALF], x[:, F_HALF:]
    s1 = _gat_ref(x1, adj, params["F1"])
    t1 = _gat_ref(x1, adj, params["F2"])
    x1n = x2 * jnp.exp(s1) + t1
    s2 = _gat_ref(x2, adj, params["G1"])
    t2 = _gat_ref(x2, adj, params["G2"])
    x2n = x1n * jnp.exp(s2) + t2
    return x1n, x2n, jnp.sum(s1, axis=1) + jnp.sum(s2, axis=1)


# ----------------------------------------------------------------------------
def init_params(key):
    params = {}
    for name in ("F1", "F2", "G1", "G2"):
        key, kw, ks, kd = jax.random.split(key, 4)
        params[name] = {
            "W": 0.25 * jax.random.normal(kw, (F_HALF, F_HALF), jnp.float32),
            "att_src": 0.2 * jax.random.normal(ks, (1, F_HALF), jnp.float32),
            "att_dst": 0.2 * jax.random.normal(kd, (1, F_HALF), jnp.float32),
            "bias": jnp.zeros((1, F_HALF), jnp.float32),
        }
    return params


if __name__ == "__main__":
    key = jax.random.PRNGKey(0)
    kx, kp = jax.random.split(key)
    params = init_params(kp)

    # two small graphs, stacked on the (parallel) grid axis of one pallas_call
    xs = jax.random.normal(kx, (2, N, F_FULL), jnp.float32)            # [2, 8, 32]
    edge_index_0 = jnp.array(
        [[0, 1, 2, 3, 4, 5, 6, 7, 1, 2, 4, 6],
         [1, 2, 3, 4, 5, 6, 7, 0, 3, 5, 0, 2]], dtype=jnp.int32)       # src / dst
    edge_index_1 = jnp.array(
        [[0, 2, 4, 6, 1, 3, 5, 7, 0, 5],
         [1, 3, 5, 7, 2, 4, 6, 0, 4, 2]], dtype=jnp.int32)
    adj_biases = jnp.stack([make_adj_bias(edge_index_0, N),
                            make_adj_bias(edge_index_1, N)])           # [2, 8, 8]

    x1_k, x2_k, ld_k = gnf_forward_batched(xs, adj_biases, params)
    jax.block_until_ready((x1_k, x2_k, ld_k))

    # Exact softmax divide -> kernel is algebraically identical to the reference;
    # tolerance only covers MXU f32 rounding from the fused / re-associated matmuls.
    for b, ei in enumerate((edge_index_0, edge_index_1)):
        x1_r, x2_r, ld_r = gnf_forward_ref(xs[b], ei, params)
        assert np.allclose(np.asarray(x1_k[b]), np.asarray(x1_r), atol=1e-3, rtol=1e-3)
        assert np.allclose(np.asarray(x2_k[b]), np.asarray(x2_r), atol=1e-3, rtol=1e-3)
        assert np.allclose(np.asarray(ld_k[b]), np.asarray(ld_r), atol=1e-3, rtol=1e-3)

    print("KERNEL_OK")
</pallas_src>

<mosaic_0001>
module attributes {stable_mosaic.version = 11 : i64} {
  func.func @gnf_kernel(%arg0: i32, %arg1: memref<1x40x40xf32, #tpu.memory_space<vmem>>, %arg2: memref<40x128xf32, #tpu.memory_space<vmem>>, %arg3: memref<1x8x48xf32, #tpu.memory_space<vmem>>) attributes {dimension_semantics = [#tpu.dimension_semantics<parallel>], iteration_bounds = array<i64: 2>, scalar_prefetch = 0 : i64, scratch_operands = 0 : i64, tpu.core_type = #tpu.core_type<tc>, window_params = [{transform_indices = @transform_0, window_bounds = array<i64: 1, 40, 40>}, {pipeline_mode = #tpu.pipeline_mode<synchronous>, transform_indices = @transform_1, window_bounds = array<i64: 40, 128>}, {transform_indices = @transform_2, window_bounds = array<i64: 1, 8, 48>}]} {
    %c0 = arith.constant 0 : index
    %c0_0 = arith.constant 0 : index
    %c0_1 = arith.constant 0 : index
    %0 = vector.load %arg1[%c0, %c0_0, %c0_1] : memref<1x40x40xf32, #tpu.memory_space<vmem>>, vector<1x40x40xf32>
    %1 = vector.shape_cast %0 : vector<1x40x40xf32> to vector<40x40xf32>
    %2 = vector.extract_strided_slice %1 {offsets = [0, 0], sizes = [8, 32], strides = [1, 1]} : vector<40x40xf32> to vector<8x32xf32>
    %3 = vector.extract_strided_slice %1 {offsets = [0, 32], sizes = [8, 8], strides = [1, 1]} : vector<40x40xf32> to vector<8x8xf32>
    %4 = vector.extract_strided_slice %1 {offsets = [8, 0], sizes = [32, 8], strides = [1, 1]} : vector<40x40xf32> to vector<32x8xf32>
    %c0_2 = arith.constant 0 : index
    %c0_3 = arith.constant 0 : index
    %5 = vector.load %arg2[%c0_2, %c0_3] : memref<40x128xf32, #tpu.memory_space<vmem>>, vector<32x96xf32>
    %c32 = arith.constant 32 : index
    %c0_4 = arith.constant 0 : index
    %6 = vector.load %arg2[%c32, %c0_4] : memref<40x128xf32, #tpu.memory_space<vmem>>, vector<4x32xf32>
    %cst = arith.constant dense<0.000000e+00> : vector<8x96xf32>
    %7 = tpu.matmul %2, %5, %cst {dimension_numbers = #tpu.dot_dimension_numbers<[1], [0], [0], [1], [0, 0, 1, 1], [], []>} : vector<8x32xf32>, vector<32x96xf32>, vector<8x96xf32> -> vector<8x96xf32>
    %cst_5 = arith.constant dense<0.000000e+00> : vector<4x8xf32>
    %8 = tpu.matmul %6, %4, %cst_5 {dimension_numbers = #tpu.dot_dimension_numbers<[1], [0], [0], [1], [0, 0, 1, 1], [], []>} : vector<4x32xf32>, vector<32x8xf32>, vector<4x8xf32> -> vector<4x8xf32>
    %9 = vector.extract_strided_slice %7 {offsets = [0, 0], sizes = [8, 16], strides = [1, 1]} : vector<8x96xf32> to vector<8x16xf32>
    %10 = vector.extract_strided_slice %7 {offsets = [0, 64], sizes = [8, 8], strides = [1, 1]} : vector<8x96xf32> to vector<8x8xf32>
    %11 = vector.extract_strided_slice %8 {offsets = [0, 0], sizes = [1, 8], strides = [1, 1]} : vector<4x8xf32> to vector<1x8xf32>
    %12 = vector.broadcast %11 : vector<1x8xf32> to vector<8x8xf32>
    %13 = arith.addf %10, %12 : vector<8x8xf32>
    %cst_6 = arith.constant 0.000000e+00 : f32
    %14 = vector.broadcast %cst_6 : f32 to vector<8x8xf32>
    %15 = arith.cmpf ogt, %13, %14 : vector<8x8xf32>
    %cst_7 = arith.constant 2.000000e-01 : f32
    %16 = vector.broadcast %cst_7 : f32 to vector<8x8xf32>
    %17 = arith.mulf %16, %13 : vector<8x8xf32>
    %18 = arith.select %15, %13, %17 : vector<8x8xi1>, vector<8x8xf32>
    %19 = arith.addf %18, %3 : vector<8x8xf32>
    %cst_8 = arith.constant dense<0xFF800000> : vector<8xf32>
    %20 = vector.multi_reduction <maximumf>, %19, %cst_8 [1] : vector<8x8xf32> to vector<8xf32>
    %21 = vector.shape_cast %20 : vector<8xf32> to vector<8x1xf32>
    %22 = vector.broadcast %21 : vector<8x1xf32> to vector<8x8xf32>
    %23 = arith.subf %19, %22 : vector<8x8xf32>
    %24 = math.exp %23 : vector<8x8xf32>
    %cst_9 = arith.constant dense<0.000000e+00> : vector<8xf32>
    %25 = vector.multi_reduction <add>, %24, %cst_9 [1] : vector<8x8xf32> to vector<8xf32>
    %26 = vector.shape_cast %25 : vector<8xf32> to vector<8x1xf32>
    %27 = vector.broadcast %26 : vector<8x1xf32> to vector<8x8xf32>
    %28 = arith.divf %24, %27 : vector<8x8xf32>
    %c36 = arith.constant 36 : index
    %c0_10 = arith.constant 0 : index
    %29 = vector.load %arg2[%c36, %c0_10] : memref<40x128xf32, #tpu.memory_space<vmem>>, vector<1x16xf32>
    %cst_11 = arith.constant dense<0.000000e+00> : vector<8x16xf32>
    %30 = tpu.matmul %28, %9, %cst_11 {dimension_numbers = #tpu.dot_dimension_numbers<[1], [0], [0], [1], [0, 0, 1, 1], [], []>} : vector<8x8xf32>, vector<8x16xf32>, vector<8x16xf32> -> vector<8x16xf32>
    %31 = vector.broadcast %29 : vector<1x16xf32> to vector<8x16xf32>
    %32 = arith.addf %30, %31 : vector<8x16xf32>
    %33 = vector.extract_strided_slice %7 {offsets = [0, 16], sizes = [8, 16], strides = [1, 1]} : vector<8x96xf32> to vector<8x16xf32>
    %34 = vector.extract_strided_slice %7 {offsets = [0, 72], sizes = [8, 8], strides = [1, 1]} : vector<8x96xf32> to vector<8x8xf32>
    %35 = vector.extract_strided_slice %8 {offsets = [1, 0], sizes = [1, 8], strides = [1, 1]} : vector<4x8xf32> to vector<1x8xf32>
    %36 = vector.broadcast %35 : vector<1x8xf32> to vector<8x8xf32>
    %37 = arith.addf %34, %36 : vector<8x8xf32>
    %cst_12 = arith.constant 0.000000e+00 : f32
    %38 = vector.broadcast %cst_12 : f32 to vector<8x8xf32>
    %39 = arith.cmpf ogt, %37, %38 : vector<8x8xf32>
    %cst_13 = arith.constant 2.000000e-01 : f32
    %40 = vector.broadcast %cst_13 : f32 to vector<8x8xf32>
    %41 = arith.mulf %40, %37 : vector<8x8xf32>
    %42 = arith.select %39, %37, %41 : vector<8x8xi1>, vector<8x8xf32>
    %43 = arith.addf %42, %3 : vector<8x8xf32>
    %cst_14 = arith.constant dense<0xFF800000> : vector<8xf32>
    %44 = vector.multi_reduction <maximumf>, %43, %cst_14 [1] : vector<8x8xf32> to vector<8xf32>
    %45 = vector.shape_cast %44 : vector<8xf32> to vector<8x1xf32>
    %46 = vector.broadcast %45 : vector<8x1xf32> to vector<8x8xf32>
    %47 = arith.subf %43, %46 : vector<8x8xf32>
    %48 = math.exp %47 : vector<8x8xf32>
    %cst_15 = arith.constant dense<0.000000e+00> : vector<8xf32>
    %49 = vector.multi_reduction <add>, %48, %cst_15 [1] : vector<8x8xf32> to vector<8xf32>
    %50 = vector.shape_cast %49 : vector<8xf32> to vector<8x1xf32>
    %51 = vector.broadcast %50 : vector<8x1xf32> to vector<8x8xf32>
    %52 = arith.divf %48, %51 : vector<8x8xf32>
    %c37 = arith.constant 37 : index
    %c0_16 = arith.constant 0 : index
    %53 = vector.load %arg2[%c37, %c0_16] : memref<40x128xf32, #tpu.memory_space<vmem>>, vector<1x16xf32>
    %cst_17 = arith.constant dense<0.000000e+00> : vector<8x16xf32>
    %54 = tpu.matmul %52, %33, %cst_17 {dimension_numbers = #tpu.dot_dimension_numbers<[1], [0], [0], [1], [0, 0, 1, 1], [], []>} : vector<8x8xf32>, vector<8x16xf32>, vector<8x16xf32> -> vector<8x16xf32>
    %55 = vector.broadcast %53 : vector<1x16xf32> to vector<8x16xf32>
    %56 = arith.addf %54, %55 : vector<8x16xf32>
    %57 = vector.extract_strided_slice %7 {offsets = [0, 32], sizes = [8, 16], strides = [1, 1]} : vector<8x96xf32> to vector<8x16xf32>
    %58 = vector.extract_strided_slice %7 {offsets = [0, 80], sizes = [8, 8], strides = [1, 1]} : vector<8x96xf32> to vector<8x8xf32>
    %59 = vector.extract_strided_slice %8 {offsets = [2, 0], sizes = [1, 8], strides = [1, 1]} : vector<4x8xf32> to vector<1x8xf32>
    %60 = vector.broadcast %59 : vector<1x8xf32> to vector<8x8xf32>
    %61 = arith.addf %58, %60 : vector<8x8xf32>
    %cst_18 = arith.constant 0.000000e+00 : f32
    %62 = vector.broadcast %cst_18 : f32 to vector<8x8xf32>
    %63 = arith.cmpf ogt, %61, %62 : vector<8x8xf32>
    %cst_19 = arith.constant 2.000000e-01 : f32
    %64 = vector.broadcast %cst_19 : f32 to vector<8x8xf32>
    %65 = arith.mulf %64, %61 : vector<8x8xf32>
    %66 = arith.select %63, %61, %65 : vector<8x8xi1>, vector<8x8xf32>
    %67 = arith.addf %66, %3 : vector<8x8xf32>
    %cst_20 = arith.constant dense<0xFF800000> : vector<8xf32>
    %68 = vector.multi_reduction <maximumf>, %67, %cst_20 [1] : vector<8x8xf32> to vector<8xf32>
    %69 = vector.shape_cast %68 : vector<8xf32> to vector<8x1xf32>
    %70 = vector.broadcast %69 : vector<8x1xf32> to vector<8x8xf32>
    %71 = arith.subf %67, %70 : vector<8x8xf32>
    %72 = math.exp %71 : vector<8x8xf32>
    %cst_21 = arith.constant dense<0.000000e+00> : vector<8xf32>
    %73 = vector.multi_reduction <add>, %72, %cst_21 [1] : vector<8x8xf32> to vector<8xf32>
    %74 = vector.shape_cast %73 : vector<8xf32> to vector<8x1xf32>
    %75 = vector.broadcast %74 : vector<8x1xf32> to vector<8x8xf32>
    %76 = arith.divf %72, %75 : vector<8x8xf32>
    %c38 = arith.constant 38 : index
    %c0_22 = arith.constant 0 : index
    %77 = vector.load %arg2[%c38, %c0_22] : memref<40x128xf32, #tpu.memory_space<vmem>>, vector<1x16xf32>
    %cst_23 = arith.constant dense<0.000000e+00> : vector<8x16xf32>
    %78 = tpu.matmul %76, %57, %cst_23 {dimension_numbers = #tpu.dot_dimension_numbers<[1], [0], [0], [1], [0, 0, 1, 1], [], []>} : vector<8x8xf32>, vector<8x16xf32>, vector<8x16xf32> -> vector<8x16xf32>
    %79 = vector.broadcast %77 : vector<1x16xf32> to vector<8x16xf32>
    %80 = arith.addf %78, %79 : vector<8x16xf32>
    %81 = vector.extract_strided_slice %7 {offsets = [0, 48], sizes = [8, 16], strides = [1, 1]} : vector<8x96xf32> to vector<8x16xf32>
    %82 = vector.extract_strided_slice %7 {offsets = [0, 88], sizes = [8, 8], strides = [1, 1]} : vector<8x96xf32> to vector<8x8xf32>
    %83 = vector.extract_strided_slice %8 {offsets = [3, 0], sizes = [1, 8], strides = [1, 1]} : vector<4x8xf32> to vector<1x8xf32>
    %84 = vector.broadcast %83 : vector<1x8xf32> to vector<8x8xf32>
    %85 = arith.addf %82, %84 : vector<8x8xf32>
    %cst_24 = arith.constant 0.000000e+00 : f32
    %86 = vector.broadcast %cst_24 : f32 to vector<8x8xf32>
    %87 = arith.cmpf ogt, %85, %86 : vector<8x8xf32>
    %cst_25 = arith.constant 2.000000e-01 : f32
    %88 = vector.broadcast %cst_25 : f32 to vector<8x8xf32>
    %89 = arith.mulf %88, %85 : vector<8x8xf32>
    %90 = arith.select %87, %85, %89 : vector<8x8xi1>, vector<8x8xf32>
    %91 = arith.addf %90, %3 : vector<8x8xf32>
    %cst_26 = arith.constant dense<0xFF800000> : vector<8xf32>
    %92 = vector.multi_reduction <maximumf>, %91, %cst_26 [1] : vector<8x8xf32> to vector<8xf32>
    %93 = vector.shape_cast %92 : vector<8xf32> to vector<8x1xf32>
    %94 = vector.broadcast %93 : vector<8x1xf32> to vector<8x8xf32>
    %95 = arith.subf %91, %94 : vector<8x8xf32>
    %96 = math.exp %95 : vector<8x8xf32>
    %cst_27 = arith.constant dense<0.000000e+00> : vector<8xf32>
    %97 = vector.multi_reduction <add>, %96, %cst_27 [1] : vector<8x8xf32> to vector<8xf32>
    %98 = vector.shape_cast %97 : vector<8xf32> to vector<8x1xf32>
    %99 = vector.broadcast %98 : vector<8x1xf32> to vector<8x8xf32>
    %100 = arith.divf %96, %99 : vector<8x8xf32>
    %c39 = arith.constant 39 : index
    %c0_28 = arith.constant 0 : index
    %101 = vector.load %arg2[%c39, %c0_28] : memref<40x128xf32, #tpu.memory_space<vmem>>, vector<1x16xf32>
    %cst_29 = arith.constant dense<0.000000e+00> : vector<8x16xf32>
    %102 = tpu.matmul %100, %81, %cst_29 {dimension_numbers = #tpu.dot_dimension_numbers<[1], [0], [0], [1], [0, 0, 1, 1], [], []>} : vector<8x8xf32>, vector<8x16xf32>, vector<8x16xf32> -> vector<8x16xf32>
    %103 = vector.broadcast %101 : vector<1x16xf32> to vector<8x16xf32>
    %104 = arith.addf %102, %103 : vector<8x16xf32>
    %105 = vector.extract_strided_slice %2 {offsets = [0, 16], sizes = [8, 16], strides = [1, 1]} : vector<8x32xf32> to vector<8x16xf32>
    %106 = math.exp %32 : vector<8x16xf32>
    %107 = arith.mulf %105, %106 : vector<8x16xf32>
    %108 = arith.addf %107, %56 : vector<8x16xf32>
    %109 = math.exp %80 : vector<8x16xf32>
    %110 = arith.mulf %108, %109 : vector<8x16xf32>
    %111 = arith.addf %110, %104 : vector<8x16xf32>
    %cst_30 = arith.constant dense<0.000000e+00> : vector<8xf32>
    %112 = vector.multi_reduction <add>, %32, %cst_30 [1] : vector<8x16xf32> to vector<8xf32>
    %113 = vector.shape_cast %112 : vector<8xf32> to vector<8x1xf32>
    %cst_31 = arith.constant dense<0.000000e+00> : vector<8xf32>
    %114 = vector.multi_reduction <add>, %80, %cst_31 [1] : vector<8x16xf32> to vector<8xf32>
    %115 = vector.shape_cast %114 : vector<8xf32> to vector<8x1xf32>
    %116 = arith.addf %113, %115 : vector<8x1xf32>
    %117 = vector.shape_cast %116 : vector<8x1xf32> to vector<8x1xf32>
    %118 = vector.broadcast %117 : vector<8x1xf32> to vector<8x16xf32>
    %119 = tpu.concatenate %108, %111, %118 in 1 : vector<8x16xf32>, vector<8x16xf32>, vector<8x16xf32> -> vector<8x48xf32>
    %c0_32 = arith.constant 0 : index
    %c0_33 = arith.constant 0 : index
    %c0_34 = arith.constant 0 : index
    %120 = vector.load %arg3[%c0_32, %c0_33, %c0_34] : memref<1x8x48xf32, #tpu.memory_space<vmem>>, vector<1x8x48xf32>
    %121 = vector.shape_cast %120 : vector<1x8x48xf32> to vector<8x48xf32>
    %122 = vector.shape_cast %119 : vector<8x48xf32> to vector<1x8x48xf32>
    tpu.vector_store %arg3[%c0_32, %c0_33, %c0_34], %122 {strides = array<i32>} : memref<1x8x48xf32, #tpu.memory_space<vmem>>, vector<1x8x48xf32>,
    return
  }
  func.func @transform_0(%arg0: i32) -> (i32, i32, i32) {
    %c0_i32 = arith.constant 0 : i32
    %c0_i32_0 = arith.constant 0 : i32
    %c0_i32_1 = arith.constant 0 : i32
    return %arg0, %c0_i32, %c0_i32_0 : i32, i32, i32
  }
  func.func @transform_1(%arg0: i32) -> (i32, i32) {
    %c0_i32 = arith.constant 0 : i32
    %c0_i32_0 = arith.constant 0 : i32
    %c0_i32_1 = arith.constant 0 : i32
    return %c0_i32, %c0_i32_0 : i32, i32
  }
  func.func @transform_2(%arg0: i32) -> (i32, i32, i32) {
    %c0_i32 = arith.constant 0 : i32
    %c0_i32_0 = arith.constant 0 : i32
    %c0_i32_1 = arith.constant 0 : i32
    return %arg0, %c0_i32, %c0_i32_0 : i32, i32, i32
  }
}

</mosaic_0001>

<bundles_post_ra>
// kernel: tpu_custom_call.1
= control target key start
LH: loop header
LB: loop body
LE: loop exit
PB: predicated region body
PF: predicated region fallthrough
CT: control target
= control target key end

     0   :  { %7 = vsyncpa [#allocation3], 0  ;;  %s1558_s0 = inlined_call_operand.hbm [shape: f32[2,40,40], index: 0, kind: input, shape index: {}]   ;;  %s1559_s1 = inlined_call_operand.hbm [shape: f32[40,128], index: 1, kind: input, shape index: {}]   ;;  %s1560_s2 = inlined_call_operand.hbm [shape: f32[2,8,48], index: 2, kind: output, shape index: {}]  }
   0x1   :  { %9 = vsyncpa [#allocation3 + $0x1], 0 }
   0x2   :  { %10 = vsyncpa [#allocation6], 0 }
   0x3   :  { %11 = vsyncpa [#allocation4], 0 }
   0x4   :  { %13 = vsyncpa [#allocation4 + $0x1], 0  ;;  %s1281_s9 = smov 0   ;;  %s1283_s10 = smov 0  }
   0x5   :  { %s1285_s11 = smov 0   ;;  %s1287_s12 = smov 0  }
   0x6 LB: > { %s1302_s13 = sadd.s32 4294967295, %s1245_s12   ;;  %s927_s14 = sadd.s32 4294967294, %s1245_s12   ;;  %s1245_s12 = sphi %s1287_s12, %s1580_s12   ;;  %s1241_s11 = sphi %s1285_s11, %s1579_s11   ;;  %s1237_s10 = sphi %s1283_s10, %s1578_s10   ;;  %s1233_s9 = sphi %s1281_s9, %s1577_s9  }
   0x7   : > { %p39_p0 = scmp.ne.s32.totalorder %s1237_s10, %s1233_s9  ;;  %p1561_p1 = scmp.eq.s32.totalorder %s1302_s13, 0 }
   0x8   : > { %p90_p3 = scmp.eq.s32.totalorder %s927_s14, 1  ;;  %p928_p5 = scmp.ge.s32.totalorder %s1245_s12, 1 }
   0x9   : > { %p1311_p4 = por %p1561_p1, %p39_p0  ;;  %p97_p7 = scmp.lt.s32.totalorder %s1245_s12, 3 }
   0xa   : > { %p1316_p6 = por %p90_p3, %p39_p0  ;;  %s1247_s18 = smov [#allocation5]  }
   0xb   : > { %s1564_s15 = scalar_select %p1311_p4, 1, 0 }
   0xc   : > { %s1565_s16 = scalar_select %p1316_p6, 1, 0 }
   0xd   : > { %p1321_p8 = pnand %p928_p5, %p97_p7  ;;  %s109_s19 = sshll.u32 %s1247_s18, 4  ;;  %s1325_s19 = int_to_ptr.vmem [resolvable:$true] %s109_s19 }
   0xe   : > { %s1337_s21 = sadd.s32 1, %s1245_s12   ;;  %s26_s22 = sadd.s32 1, %s1241_s11 }
   0xf   : > { %s1566_s17 = scalar_select %p1321_p8, 1, 0 }
  0x10   : > { %p1032_p9 = pneg %p1321_p8  ;;  %s23_s23 = ssub.s32 %s1245_s12, %s1337_s21 }
  0x11   : > { %s1117_s26 = scalar_lea.hbm %s1559_s1, 640 }
  0x12   : > { %p1332_p11 = pnand %p1032_p9, %p1561_p1  ;;  %p1118_p12 = scmp.ne.s32.totalorder %s1559_s1, %s1117_s26 }
  0x13   : > { %p1124_p5 = scmp.lt.u32.totalorder %s1117_s26, %s1559_s1 }
  0x14   : > { %p1119_p13 = pneg %p1332_p11 }
  0x16   : > { %p1120_p0 = pnand %p1119_p13, %p1118_p12 }
  0x18   : > { %p1121_p3 = pneg %p1120_p0 }
  0x1a   : > { %p1126_p7 = pnand %p1124_p5, %p1121_p3 }
  0x1c   : > { %1129 = shalt.err (!%p1126_p7)
}
  0x1d   : > { %s1130_s3 = scalar_lea.vmem %s1325_s19, 640  ;;  %p1138_p2 = scmp.lt.s32.totalorder %s1325_s19, %s1325_s19 }
  0x1e   : > { %p1131_p9 = scmp.ne.s32.totalorder %s1325_s19, %s1130_s3  ;;  %p1139_p6 = scmp.lt.s32.totalorder %s1130_s3, %s1130_s3 }
  0x20   : > { %p1133_p10 = pnand %p1131_p9, %p1119_p13  ;;  %p1140_p4 = por %p1139_p6, %p1138_p2 }
  0x22   : > { %p1134_p1 = pneg %p1133_p10 }
  0x24   : > { %p1141_p8 = pnand %p1140_p4, %p1134_p1 }
  0x26   : > { %1144 = shalt.err (!%p1141_p8)
}
  0x27   : > { %s1248_s4 = smov 128   ;;  %s1249_s5 = smov 8  }
  0x28   : > { %1035 = dma.hbm_to_vmem [thread:$0]  (!%p1332_p11), %s1559_s1, 640, %s1325_s19, [#allocation6], %s1248_s4, %s1248_s4, %s1249_s5  }
  0x29   : > { %p24_p1 = scmp.eq.s32.totalorder %s23_s23, 0  ;;  %p33_p2 = scmp.ne.s32.totalorder %s1241_s11, %s1237_s10 }
  0x2a   : > { %p34_p4 = scmp.eq.s32.totalorder %s1245_s12, 0  ;;  %p1045_p6 = scmp.lt.s32.totalorder %s1245_s12, 2 }
  0x2b   : > { %s1371_s8 = scalar_select %p24_p1, %s1241_s11, %s26_s22  }
  0x2c   : > { %p35_p8 = por %p34_p4, %p33_p2  ;;  %p1568_p10 = scmp.eq.s32.totalorder %s1302_s13, 1 }
  0x2d   : > { %s123_s18 = sand.u32 1, %s1241_s11   ;;  %s1022_s20 = smul.u32 640, %s1245_s12 }
  0x2e   : > { %p1375_p12 = por %p1568_p10, %p33_p2  ;;  %s1021_s24 = smul.u32 40, %s123_s18 }
  0x2f   : > { %p1381_p13 = pnand %p1045_p6, %p35_p8  ;;  %s1388_s22 = scalar_lea.hbm %s1558_s0, %s1022_s20 }
  0x30   : > { %s127_s26 = scalar_lea.vmem [#allocation2], %s1021_s24  ;;  %s1392_s28 = scalar_lea.sflag [#allocation3], %s123_s18 }
  0x31   : > { %s134_s27 = sshll.u32 %s127_s26, 4  ;;  %s1145_s29 = scalar_lea.hbm %s1388_s22, 640  ;;  %s1390_s27 = int_to_ptr.vmem [resolvable:$true] %s134_s27 }
  0x32   : > { %p1146_p11 = scmp.ne.s32.totalorder %s1388_s22, %s1145_s29  ;;  %p1147_p0 = pneg %p1381_p13 }
  0x33   : > { %s1150_s6 = scalar_lea.hbm %s1558_s0, 1280  ;;  %p1151_p7 = scmp.lt.u32.totalorder %s1388_s22, %s1558_s0 }
  0x34   : > { %p1148_p3 = pnand %p1147_p0, %p1146_p11  ;;  %p1152_p9 = scmp.lt.u32.totalorder %s1150_s6, %s1145_s29 }
  0x35   : > { %p1154_p2 = scmp.lt.u32.totalorder %s1145_s29, %s1388_s22 }
  0x36   : > { %p1149_p5 = pneg %p1148_p3  ;;  %p1153_p1 = por %p1152_p9, %p1151_p7 }
  0x38   : > { %p1155_p4 = por %p1154_p2, %p1153_p1 }
  0x3a   : > { %p1156_p6 = pnand %p1155_p4, %p1149_p5 }
  0x3c   : > { %1159 = shalt.err (!%p1156_p6)
}
  0x3d   : > { %s1160_s18 = scalar_lea.vmem %s1390_s27, 640  ;;  %s1250_s24 = smov [#allocation2]  }
  0x3e   : > { %p1161_p8 = scmp.ne.s32.totalorder %s1390_s27, %s1160_s18  ;;  %s1165_s19 = sshll.u32 %s1250_s24, 4  ;;  %s1166_s19 = int_to_ptr.vmem [resolvable:$false] %s1165_s19 }
  0x3f   : > { %s1167_s23 = scalar_lea.vmem %s1166_s19, 1280  ;;  %p1168_p3 = scmp.lt.s32.totalorder %s1390_s27, %s1166_s19 }
  0x40   : > { %p1163_p10 = pnand %p1161_p8, %p1147_p0  ;;  %p1169_p7 = scmp.lt.s32.totalorder %s1167_s23, %s1160_s18 }
  0x42   : > { %p1164_p11 = pneg %p1163_p10  ;;  %p1170_p9 = por %p1169_p7, %p1168_p3 }
  0x44   : > { %p1171_p1 = pnand %p1170_p9, %p1164_p11 }
  0x46   : > { %1174 = shalt.err (!%p1171_p1)
}
  0x47   : > { %1039 = dma.hbm_to_vmem [thread:$0]  (!%p1381_p13), %s1388_s22, 640, %s1390_s27, %s1392_s28, %s1248_s4, %s1248_s4, %s1249_s5  }
  0x48   : > { %p1571_p0 = scmp.ne.s32.totalorder %s1566_s17, 0 }
  0x49   : > { %s1426_s26 = sand.u32 (!%p1571_p0), 1, %s1237_s10   ;;  %p1572_p5 = scmp.ne.s32.totalorder (!%p1571_p0), %s1564_s15, 0 }
  0x4a   : > { %146 = sbr.rel (%p1571_p0) target bundleno = 1453 (0x5ad), region = 28  ;;  %s149_s30 = scalar_lea.sflag (!%p1571_p0), [#allocation3], %s1426_s26 }
  0x4b   : > { %s1023_s29 = smul.u32 (!%p1571_p0), 40, %s1426_s26 }
  0x4d   : > { %s1430_s3 = scalar_lea.vmem (!%p1571_p0), [#allocation2], %s1023_s29 }
  0x51   : > { %1220 = dma.done.wait (%p1572_p5), %s149_s30, 640  }
  0x52   : > { %1222 = vsyncadd (%p1572_p5), %s149_s30, 4294966656  ;;  %p1573_p13 = scmp.eq.s32.totalorder %s1302_s13, 0 }
  0x54   : > { %1224 = dma.done.wait (%p1573_p13), [#allocation6], 640   ;;  %p1574_p2 = pmov %p1573_p13 }
  0x55   : > { %v1251_v0 = vmov 0.0|0.0   ;;  %vm1252_vm0 = vmmov 0   ;;  %v1253_v1 = vmov 0.0   ;;  %v178_v2 = vld [vmem:[%s1430_s3 + $0x8] sm:$0xff]  ;;  %v179_v3 = vld [vmem:[%s1430_s3 + $0x10] sm:$0xff]  ;;  %v180_v4 = vld [vmem:[%s1430_s3 + $0x18] sm:$0xff]  ;;  %v334_v16 = vlaneseq }
  0x56   : > { %1226 = vsyncadd (%p1574_p2), [#allocation6], 4294966656  ;;  %1015 = vmatprep.subr.bf16.mxu1 %v1251_v0  ;;  %986 = vmatprep.mubr.msk.f32.mxu1 %vm1252_vm0, %v1253_v1  ;;  %v1016_v5 = vpack.c.bf16 %v179_v3, %v178_v2  ;;  %v181_v6 = vld [vmem:[%s1430_s3 + $0x20] sm:$0xff]  ;;  %v182_v7 = vld [vmem:[#allocation5] sm:$0xff]  ;;  %vm187_vm1 = vcmask 261120   ;;  %s1254_s15 = smov 72  }
  0x57   : > { %1009 = vmatprep.subr.bf16.mxu0 %v1251_v0  ;;  %975 = vmatprep.mubr.msk.f32.mxu0 %vm1252_vm0, %v1253_v1  ;;  %v183_v8 = vld [vmem:[#allocation5 + $0x8] sm:$0xff]  ;;  %v184_v9 = vld [vmem:[#allocation5 + $0x10] sm:$0xff]  ;;  %v185_v10 = vld [vmem:[#allocation5 + $0x18] sm:$0xff]  ;;  %v1019_v11 = vpack.c.bf16 %v181_v6, %v180_v4  ;;  %v335_v17 = vshrl.u32 %v334_v16, 7  ;;  %s1255_s17 = smov 64   ;;  %s1256_s4 = smov 40  }
  0x58   : > { %1017 = vmatpush3.bf16.msra.mxu1 %v1016_v5  ;;  %v1010_v12 = vpack.c.bf16 %v183_v8, %v182_v7  ;;  %v1013_v13 = vpack.c.bf16 %v185_v10, %v184_v9  ;;  %v186_v14 = vld [vmem:[#allocation5 + $0x20] sm:$0xf]  ;;  %v1450_v15 = vld [vmem:[%s1430_s3] sm:$0xff]  ;;  %s1257_s5 = smov 32   ;;  %s1258_s25 = smov 48   ;;  %vm463_vm4 = vcmask 654912  }
  0x59   : > { %1018 = vmatprep.subr.bf16.mxu1 %v1251_v0  ;;  %v449_v18 = vsub.s32 1, %v335_v17  ;;  %v336_v19 = vsub.s32 0, %v335_v17  ;;  %v565_v26 = vsub.s32 2, %v335_v17  ;;  %v680_v28 = vsub.s32 3, %v335_v17  ;;  %s1259_s22 = smov 80   ;;  %s1260_s27 = smov 88  }
  0x5a   : > { %1011 = vmatpush3.bf16.msra.mxu0 %v1010_v12  ;;  %s1261_s28 = smov 56   ;;  %vm350_vm5 = vcmask 589312   ;;  %vm579_vm7 = vcmask 720512   ;;  %vm694_vm9 = vcmask 786112   ;;  %vm361_vm10 = vcmask 64512   ;;  %s1262_s6 = smov 112  }
  0x5b   : > { %1012 = vmatprep.subr.bf16.mxu0 %v1251_v0  ;;  %s1263_s7 = smov 96   ;;  %s1264_s20 = smov 16   ;;  %vm817_vm11 = vcmask 130048   ;;  %vm831_vm12 = vcmask 392192  }
  0x5c   : > { %1020 = vmatpush3.bf16.msra.mxu1 %v1019_v11  ;;  %s934_s18 = sshll.u32 %s1426_s26, 3  ;;  %s946_s24 = sshll.u32 %s1302_s13, 7 }
  0x5d   : > { %994 = vmatprep.subr.mxu1 %v1253_v1  ;;  %s176_s19 = scalar_lea.vmem [#allocation7], %s934_s18  ;;  %s1513_s3 = scalar_lea.hbm %s1560_s2, %s946_s24 }
  0x5e   : > { %1014 = vmatpush3.bf16.msra.mxu0 %v1013_v13  ;;  %s847_s23 = sshll.u32 %s176_s19, 4  ;;  %s834_s13 = scalar_lea.sflag [#allocation4], %s1426_s26  ;;  %s1515_s23 = int_to_ptr.vmem [resolvable:$true] %s847_s23 }
  0x5f   : > { %987 = vmatmul.mubr.msk.f32.vlgmr.msra.gmra.mrb[0].mxu1 %vm187_vm1, %v186_v14  ;;  %989 = vmatprep.subr.mxu0 %v1253_v1 }
  0x60   : > { %996 = vmatprep.mubr.msk.f32.mxu1 %vm1252_vm0, %v1253_v1 }
  0x61   : > { %976 = vmatmul.mubr.msk.f32.vlgmr.msra.gmra.mrb[0].mxu0 %vm187_vm1, %v1450_v15 }
  0x62   : > { %991 = vmatprep.mubr.msk.f32.mxu0 %vm1252_vm0, %v1253_v1 }
 0x132   : > { %v330_v20 = vpop.f32.mrb[0].mxu1 }
 0x133   : > { %v988_v21 = vpop.f32.mrb[1].mxu1  ;;  %v450_v22 = vrot.slane %v330_v20, %v449_v18  ;;  %v337_v23 = vrot.slane %v330_v20, %v336_v19  ;;  %v566_v27 = vrot.slane %v330_v20, %v565_v26  ;;  %v681_v29 = vrot.slane %v330_v20, %v680_v28 }
 0x134   : > { %v1460_v24 = vpop.f32.mrb[0].mxu0 }
 0x135   : > { %452 = vrot.lane.b32.xlu1 %v450_v22, %s1254_s15  ;;  %339 = vrot.lane.b32.xlu0 %v337_v23, %s1255_s17  ;;  %v977_v25 = vpop.f32.mrb[1].mxu0  ;;  %s1175_s15 = scalar_lea.vmem %s1515_s23, 128 }
 0x136   : > { %990 = vmatpush3.msra.mxu0 %v1460_v24  ;;  %p1176_p4 = scmp.ne.s32.totalorder %s1515_s23, %s1175_s15 }
 0x137   : > { %999 = vmatprep.subr.mxu0 %v1253_v1 }
 0x138   : > { %p1177_p6 = pnand %p1176_p4, %p1375_p12 }
 0x139   : > { %459 = vrot.lane.b32.xlu1 %v1450_v15, %s1256_s4  ;;  %346 = vrot.lane.b32.xlu0 %v1450_v15, %s1257_s5 }
 0x13a   : > { %p1178_p8 = pneg %p1177_p6 }
 0x13d   : > { %575 = vrot.lane.b32.xlu1 %v1450_v15, %s1258_s25  ;;  %568 = vrot.lane.b32.xlu0 %v566_v27, %s1259_s22 }
 0x141   : > { %683 = vrot.lane.b32.xlu1 %v681_v29, %s1260_s27 }
 0x145   : > { %690 = vrot.lane.b32.xlu1 %v1450_v15, %s1261_s28 }
 0x1a7   : > { %v453_v30 = vpop.permute.xlu1 %452  ;;  %v340_v31 = vpop.permute.xlu0 %339 }
 0x1a8   : > { %v455_v32 = vadd.f32 %v453_v30, %v1460_v24  ;;  %v342_v33 = vadd.f32 %v340_v31, %v1460_v24 }
 0x1aa   : > { %v457_v34 = vmul.f32 0.2, %v455_v32  ;;  %v344_v35 = vmul.f32 0.2, %v342_v33  ;;  %vm456_vm2 = vcmp.gt.f32.partialorder %v455_v32, 0.0  ;;  %vm343_vm3 = vcmp.gt.f32.partialorder %v342_v33, 0.0 }
 0x1ab   : > { %v460_v36 = vpop.permute.xlu1 %459  ;;  %v347_v37 = vpop.permute.xlu0 %346 }
 0x1ac   : > { %v458_v38 = vsel %vm456_vm2, %v455_v32, %v457_v34  ;;  %v345_v39 = vsel %vm343_vm3, %v342_v33, %v344_v35 }
 0x1ad   : > { %v462_v40 = vadd.f32 %v460_v36, %v458_v38  ;;  %v349_v41 = vadd.f32 %v347_v37, %v345_v39 }
 0x1af   : > { %v576_v42 = vpop.permute.xlu1 %575  ;;  %v569_v43 = vpop.permute.xlu0 %568  ;;  %v464_v44 = vsel %vm463_vm4, %v462_v40, -inf  ;;  %v351_v45 = vsel %vm350_vm5, %v349_v41, -inf }
 0x1b0   : > { %v571_v46 = vadd.f32 %v569_v43, %v1460_v24  ;;  %465 = vmax.xlane.f32.xlu1 %v464_v44  ;;  %352 = vmax.xlane.f32.xlu0 %v351_v45  ;;  %v939_v43 = vld [vmem:[#allocation5 + $0x25] ss:$0 sm:$0xff] }
 0x1b2   : > { %vm572_vm6 = vcmp.gt.f32.partialorder %v571_v46, 0.0  ;;  %v573_v47 = vmul.f32 0.2, %v571_v46 }
 0x1b3   : > { %v684_v48 = vpop.permute.xlu1 %683 }
 0x1b4   : > { %v686_v49 = vadd.f32 %v684_v48, %v1460_v24  ;;  %v574_v50 = vsel %vm572_vm6, %v571_v46, %v573_v47  ;;  %v941_v47 = vld [vmem:[#allocation5 + $0x26] ss:$0 sm:$0xff] }
 0x1b5   : > { %v578_v51 = vadd.f32 %v576_v42, %v574_v50 }
 0x1b6   : > { %v688_v52 = vmul.f32 0.2, %v686_v49  ;;  %vm687_vm8 = vcmp.gt.f32.partialorder %v686_v49, 0.0 }
 0x1b7   : > { %v691_v53 = vpop.permute.xlu1 %690  ;;  %v580_v54 = vsel %vm579_vm7, %v578_v51, -inf }
 0x1b8   : > { %v689_v55 = vsel %vm687_vm8, %v686_v49, %v688_v52  ;;  %581 = vmax.xlane.f32.xlu0 %v580_v54 }
 0x1b9   : > { %v693_v56 = vadd.f32 %v691_v53, %v689_v55 }
 0x1bb   : > { %v695_v57 = vsel %vm694_vm9, %v693_v56, -inf }
 0x1bc   : > { %696 = vmax.xlane.f32.xlu0 %v695_v57 }
 0x23d   : > { %v466_v58 = vpop.xlane.xlu1 %465  ;;  %v353_v59 = vpop.xlane.xlu0 %352 }
 0x23e   : > { %v467_v60 = vsub.f32 %v462_v40, %v466_v58  ;;  %v354_v61 = vsub.f32 %v349_v41, %v353_v59 }
 0x240   : > { %v468_v62 = vmul.f32 1.442695, %v467_v60  ;;  %v355_v63 = vmul.f32 1.442695, %v354_v61 }
 0x242   : > { %1097 = vpow2.f32 %v468_v62 }
 0x243   : > { %1099 = vpow2.f32 %v355_v63 }
 0x245   : > { %v582_v0 = vpop.xlane.xlu0 %581 }
 0x246   : > { %v583_v2 = vsub.f32 %v578_v51, %v582_v0  ;;  %v943_v51 = vld [vmem:[#allocation5 + $0x27] ss:$0 sm:$0xff] }
 0x248   : > { %v584_v3 = vmul.f32 1.442695, %v583_v2 }
 0x249   : > { %v697_v4 = vpop.xlane.xlu0 %696 }
 0x24a   : > { %1101 = vpow2.f32 %v584_v3  ;;  %v698_v5 = vsub.f32 %v693_v56, %v697_v4 }
 0x24c   : > { %v1098_v6 = vpop.eup %1097  ;;  %v699_v7 = vmul.f32 1.442695, %v698_v5 }
 0x24d   : > { %v1100_v8 = vpop.eup %1099  ;;  %471 = vrot.lane.b32.xlu1 %v1098_v6, %s1261_s28 }
 0x24e   : > { %1103 = vpow2.f32 %v699_v7  ;;  %358 = vrot.lane.b32.xlu0 %v1100_v8, %s1255_s17 }
 0x254   : > { %v1102_v9 = vpop.eup %1101 }
 0x255   : > { %587 = vrot.lane.b32.xlu0 %v1102_v9, %s1258_s25 }
 0x258   : > { %v1104_v10 = vpop.eup %1103 }
 0x259   : > { %702 = vrot.lane.b32.xlu0 %v1104_v10, %s1256_s4 }
 0x2bf   : > { %v472_v11 = vpop.permute.xlu1 %471 }
 0x2c0   : > { %v359_v12 = vpop.permute.xlu0 %358  ;;  %v474_v13 = vsel %vm361_vm10, %v472_v11, 0.0 }
 0x2c1   : > { %475 = vadd.xlane.f32.xlu0 %v474_v13  ;;  %v362_v14 = vsel %vm361_vm10, %v359_v12, 0.0 }
 0x2c2   : > { %363 = vadd.xlane.f32.xlu1 %v362_v14 }
 0x2c7   : > { %v588_v16 = vpop.permute.xlu0 %587 }
 0x2c8   : > { %v590_v17 = vsel %vm361_vm10, %v588_v16, 0.0 }
 0x2c9   : > { %591 = vadd.xlane.f32.xlu1 %v590_v17 }
 0x2cb   : > { %v703_v18 = vpop.permute.xlu0 %702 }
 0x2cc   : > { %v705_v19 = vsel %vm361_vm10, %v703_v18, 0.0 }
 0x2cd   : > { %706 = vadd.xlane.f32.xlu0 %v705_v19 }
 0x2e3   : > { %488 = vrot.lane.b32.xlu0 %v1460_v24, %s1262_s6 }
 0x34e   : > { %v476_v21 = vpop.xlane.xlu0 %475 }
 0x34f   : > { %v364_v20 = vpop.xlane.xlu1 %363 }
 0x350   : > { %1105 = vrcp.f32 %v364_v20 }
 0x351   : > { %1107 = vrcp.f32 %v476_v21 }
 0x356   : > { %v592_v22 = vpop.xlane.xlu1 %591 }
 0x357   : > { %1109 = vrcp.f32 %v592_v22 }
 0x35a   : > { %v1106_v23 = vpop.eup %1105  ;;  %v707_v25 = vpop.xlane.xlu0 %706 }
 0x35b   : > { %1111 = vrcp.f32 %v707_v25  ;;  %v366_v26 = vmul.f32 %v1106_v23, %v1100_v8  ;;  %v1108_v27 = vpop.eup %1107 }
 0x35c   : > { %v478_v29 = vmul.f32 %v1108_v27, %v1098_v6 }
 0x35d   : > { %373 = vrot.lane.b32.xlu1 %v366_v26, %s1255_s17  ;;  %s1265_s17 = smov [#allocation7]  }
 0x35e   : > { %v489_v28 = vpop.permute.xlu0 %488 }
 0x35f   : > { %995 = vmatpush3.msra.mxu1 %v489_v28 }
 0x360   : > { %1004 = vmatprep.subr.mxu1 %v1253_v1 }
 0x361   : > { %v1110_v30 = vpop.eup %1109  ;;  %485 = vrot.lane.b32.xlu1 %v478_v29, %s1261_s28 }
 0x362   : > { %v594_v31 = vmul.f32 %v1110_v30, %v1102_v9 }
 0x364   : > { %601 = vrot.lane.b32.xlu0 %v594_v31, %s1258_s25 }
 0x365   : > { %v1112_v32 = vpop.eup %1111  ;;  %603 = vrot.lane.b32.xlu1 %v1460_v24, %s1263_s7 }
 0x366   : > { %v709_v33 = vmul.f32 %v1112_v32, %v1104_v10 }
 0x368   : > { %716 = vrot.lane.b32.xlu0 %v709_v33, %s1256_s4  ;;  %s1179_s4 = sshll.u32 %s1265_s17, 4  ;;  %s1180_s4 = int_to_ptr.vmem [resolvable:$false] %s1179_s4 }
 0x369   : > { %718 = vrot.lane.b32.xlu1 %v1460_v24, %s1259_s22  ;;  %v937_v24 = vld [vmem:[#allocation5 + $0x24] ss:$0 sm:$0xff]  ;;  %s1181_s5 = scalar_lea.vmem %s1180_s4, 256  ;;  %p1182_p10 = scmp.lt.s32.totalorder %s1515_s23, %s1180_s4 }
 0x36a   : > { %p1183_p11 = scmp.lt.s32.totalorder %s1181_s5, %s1175_s15 }
 0x36c   : > { %p1184_p3 = por %p1183_p11, %p1182_p10 }
 0x36e   : > { %p1185_p7 = pnand %p1184_p3, %p1178_p8 }
 0x3cf   : > { %v374_v34 = vpop.permute.xlu1 %373 }
 0x3d0   : > { %992 = vmatmul.mubr.msk.f32.vlgmr.msra.gmra.mrb[2].mxu0 %vm361_vm10, %v374_v34 }
 0x3d1   : > { %1001 = vmatprep.mubr.msk.f32.mxu0 %vm1252_vm0, %v1253_v1 }
 0x3d3   : > { %v486_v35 = vpop.permute.xlu1 %485 }
 0x3d4   : > { %997 = vmatmul.mubr.msk.f32.vlgmr.msra.gmra.mrb[2].mxu1 %vm361_vm10, %v486_v35 }
 0x3d5   : > { %1006 = vmatprep.mubr.msk.f32.mxu1 %vm1252_vm0, %v1253_v1 }
 0x3d6   : > { %v602_v36 = vpop.permute.xlu0 %601 }
 0x3d7   : > { %v604_v37 = vpop.permute.xlu1 %603 }
 0x3d8   : > { %1000 = vmatpush3.msra.mxu0 %v604_v37 }
 0x3d9   : > { %1002 = vmatmul.mubr.msk.f32.vlgmr.msra.gmra.mrb[4].mxu0 %vm361_vm10, %v602_v36 }
 0x3da   : > { %v717_v38 = vpop.permute.xlu0 %716 }
 0x3db   : > { %v719_v39 = vpop.permute.xlu1 %718 }
 0x3dc   : > { %1005 = vmatpush3.msra.mxu1 %v719_v39 }
 0x3dd   : > { %1007 = vmatmul.mubr.msk.f32.vlgmr.msra.gmra.mrb[4].mxu1 %vm361_vm10, %v717_v38 }
 0x4a3   : > { %v443_v40 = vpop.f32.mrb[2].mxu0 }
 0x4a4   : > { %v444_v41 = vadd.f32 %v937_v24, %v443_v40  ;;  %v993_v42 = vpop.f32.mrb[3].mxu0 }
 0x4a6   : > { %v793_v44 = vmul.f32 1.442695, %v444_v41  ;;  %v818_v59 = vsel %vm817_vm11, %v444_v41, 0.0 }
 0x4a7   : > { %v559_v45 = vpop.f32.mrb[2].mxu1 }
 0x4a8   : > { %1113 = vpow2.f32 %v793_v44  ;;  %v560_v46 = vadd.f32 %v939_v43, %v559_v45  ;;  %v998_v1 = vpop.f32.mrb[3].mxu1 }
 0x4aa   : > { %801 = vrot.lane.b32.xlu0 %v560_v46, %s1264_s20 }
 0x4ac   : > { %v674_v48 = vpop.f32.mrb[4].mxu0 }
 0x4ad   : > { %v675_v49 = vadd.f32 %v941_v47, %v674_v48  ;;  %v1003_v50 = vpop.f32.mrb[5].mxu0 }
 0x4af   : > { %v805_v52 = vmul.f32 1.442695, %v675_v49  ;;  %v821_v58 = vsel %vm817_vm11, %v675_v49, 0.0 }
 0x4b0   : > { %v789_v53 = vpop.f32.mrb[4].mxu1 }
 0x4b1   : > { %1115 = vpow2.f32 %v805_v52  ;;  %v790_v54 = vadd.f32 %v943_v51, %v789_v53  ;;  %v1008_v55 = vpop.f32.mrb[5].mxu1 }
 0x4b2   : > { %v1114_v56 = vpop.eup %1113 }
 0x4b3   : > { %813 = vrot.lane.b32.xlu0 %v790_v54, %s1264_s20  ;;  %796 = vrot.lane.b32.xlu1 %v1114_v56, %s1264_s20 }
 0x4bb   : > { %v1116_v57 = vpop.eup %1115 }
 0x4bc   : > { %808 = vrot.lane.b32.xlu1 %v1116_v57, %s1264_s20 }
 0x4d2   : > { %822 = vadd.xlane.f32.xlu0 %v821_v58 }
 0x4e0   : > { %819 = vadd.xlane.f32.xlu1 %v818_v59 }
 0x51c   : > { %v802_v62 = vpop.permute.xlu0 %801 }
 0x525   : > { %v797_v60 = vpop.permute.xlu1 %796  ;;  %v814_v0 = vpop.permute.xlu0 %813 }
 0x526   : > { %v799_v61 = vmul.f32 %v797_v60, %v1450_v15 }
 0x528   : > { %v804_v63 = vadd.f32 %v802_v62, %v799_v61 }
 0x52a   : > { %826 = vrot.lane.b32.xlu0 %v804_v63, %s1262_s6 }
 0x52e   : > { %v809_v2 = vpop.permute.xlu1 %808 }
 0x52f   : > { %v811_v3 = vmul.f32 %v809_v2, %v804_v63 }
 0x531   : > { %v816_v6 = vadd.f32 %v814_v0, %v811_v3 }
 0x55f   : > { %v823_v4 = vpop.xlane.xlu0 %822 }
 0x56d   : > { %v820_v5 = vpop.xlane.xlu1 %819 }
 0x56e   : > { %v824_v7 = vadd.f32 %v823_v4, %v820_v5 }
 0x59c   : > { %v827_v8 = vpop.permute.xlu0 %826 }
 0x59d   : > { %v829_v15 = vsel %vm817_vm11, %v827_v8, %v816_v6 }
 0x59e   : > { %v830_v9 = vsel %vm187_vm1, %v829_v15, %v824_v7 }
 0x59f   : > { %832 = vst.msk [vmem:[%s176_s19] sm:$0xff] %vm831_vm12, %v830_v9 }
 0x5a0   : > { %1188 = shalt.err (!%p1185_p7)
}
 0x5a1   : > { %s1189_s26 = scalar_lea.hbm %s1513_s3, 128  ;;  %s1193_s27 = scalar_lea.hbm %s1560_s2, 256 }
 0x5a2   : > { %p1190_p9 = scmp.ne.s32.totalorder %s1513_s3, %s1189_s26  ;;  %p1194_p5 = scmp.lt.u32.totalorder %s1513_s3, %s1560_s2 }
 0x5a3   : > { %p1195_p13 = scmp.lt.u32.totalorder %s1193_s27, %s1189_s26  ;;  %p1197_p4 = scmp.lt.u32.totalorder %s1189_s26, %s1513_s3 }
 0x5a4   : > { %p1191_p1 = pnand %p1190_p9, %p1375_p12 }
 0x5a5   : > { %p1196_p2 = por %p1195_p13, %p1194_p5 }
 0x5a6   : > { %p1192_p0 = pneg %p1191_p1 }
 0x5a7   : > { %p1198_p6 = por %p1197_p4, %p1196_p2 }
 0x5a9   : > { %p1199_p8 = pnand %p1198_p6, %p1192_p0 }
 0x5ab   : > { %1202 = shalt.err (!%p1199_p8)
}
 0x5ac   : > { %1030 = dma.vmem_to_hbm [thread:$0]  (%p1375_p12), %s1515_s23, 128, %s1513_s3, %s834_s13  }
 0x5ad PF: > { %s859_s7 = sand.u32 1, %s1233_s9   ;;  %p1575_p10 = scmp.ne.s32.totalorder %s1565_s16, 0 }
 0x5ae   : > { %p1576_p11 = scmp.ge.s32.totalorder %s1245_s12, 2  ;;  %s860_s20 = scalar_lea.sflag [#allocation4], %s859_s7 }
 0x5b0   : > { %p1041_p3 = pnand %p1576_p11, %p1575_p10 }
 0x5b2   : > { %1228 = dma.done.wait (!%p1041_p3), %s860_s20, 128  }
 0x5b3   : > { %1230 = vsyncadd (!%p1041_p3), %s860_s20, 4294967168  ;;  %p16_p7 = scmp.ge.s32.totalorder %s1337_s21, 4   ;;  %s1577_s9 = smov %s1237_s10 }
 0x5b4   : > { %s1578_s10 = smov %s1241_s11  ;;  %s1579_s11 = smov %s1371_s8 }
 0x5b5   : > { %s1580_s12 = smov %s1337_s21  ;;  %18 = sbr.rel (!%p16_p7) target bundleno = 6 (0x6), region = 77 }
 0x5bc   :  { %865 = vsyncpa [#allocation3], 1 }
 0x5bd   :  { %867 = vsyncpa [#allocation3 + $0x1], 1 }
 0x5be   :  { %868 = vsyncpa [#allocation6], 1 }
 0x5bf   :  { %869 = vsyncpa [#allocation4], 1 }
 0x5c0   :  { %871 = vsyncpa [#allocation4 + $0x1], 1 }

</bundles_post_ra>
